<compile_context>
chip_gen: v5e
topology: v5e:2x2
jax: 0.10.0
libtpu: 0.0.40
codegen_flags: <defaults>
</compile_context>

<pallas_src>
import functools

import jax
import jax.numpy as jnp
import numpy as np
from jax import lax
from jax.experimental import pallas as pl
from jax.experimental.pallas import tpu as pltpu


def _hwd_kernel(x_ref, w_ref, sh_ref, o_ref):
    # x_ref : (1, 4C, TS)   planar input slab (channels on sublanes, spatial on lanes)
    # w_ref : (out_ch, 4C)  Haar- and BN-scale-folded 1x1-conv weight
    # sh_ref: (out_ch, 1)   folded BN shift
    # o_ref : (1, out_ch, TS)
    acc = jnp.dot(w_ref[...], x_ref[0],
                  preferred_element_type=jnp.float32)        # (out_ch, TS) on MXU
    y = acc + sh_ref[...]                                     # fused BN shift
    o_ref[0] = (y * jax.nn.sigmoid(y)).astype(o_ref.dtype)    # SiLU, lane-dense store


@functools.partial(jax.jit, static_argnames=("compute_dtype",))
def hwd_forward(x, weight, gamma, beta, running_mean, running_var,
                *, eps=1e-5, compute_dtype=jnp.float32):
    """x: (B, C, H, W) NCHW.  weight: (out_ch, 4*C) 1x1-conv weight (cat order
    [yL, yH0, yH1, yH2]).  Returns (B, out_ch, H//2, W//2) float32."""
    B, C, H, W = x.shape
    assert H % 2 == 0 and W % 2 == 0, "HWD expects even spatial dims"
    Ho, Wo = H // 2, W // 2
    S = Ho * Wo
    out_ch = weight.shape[0]
    assert weight.shape == (out_ch, 4 * C)

    # ---- Fold Haar DWT + BN scale into the 1x1-conv weight (trace time, f32) ----
    w = weight.astype(jnp.float32).reshape(out_ch, 4, C)
    w0, w1, w2, w3 = w[:, 0], w[:, 1], w[:, 2], w[:, 3]
    wa = 0.5 * (w0 + w1 + w2 + w3)   # coeff of x[2i,   2j  ]
    wb = 0.5 * (w0 + w1 - w2 - w3)   # coeff of x[2i,   2j+1]
    wc = 0.5 * (w0 - w1 + w2 - w3)   # coeff of x[2i+1, 2j  ]
    wd = 0.5 * (w0 - w1 - w2 + w3)   # coeff of x[2i+1, 2j+1]
    scale = gamma.astype(jnp.float32) * lax.rsqrt(running_var.astype(jnp.float32) + eps)
    wfold = jnp.concatenate([wa, wb, wc, wd], axis=1) * scale[:, None]   # (out_ch, 4C)
    shift = (beta.astype(jnp.float32)
             - running_mean.astype(jnp.float32) * scale).reshape(out_ch, 1)
    wfold = wfold.astype(compute_dtype)

    # ---- Single data-movement pass: NCHW -> planar (B, 4C, Ho*Wo) ----
    # 4C index = h2*2C + w2*C + c, matching the [a|b|c|d] weight order above.
    xt = jnp.transpose(x.reshape(B, C, Ho, 2, Wo, 2), (0, 3, 5, 1, 2, 4))
    xt = xt.reshape(B, 4 * C, S).astype(compute_dtype)

    # ---- Spatial (lane) tile sized from a VMEM budget ----
    in_bytes = 4 * C * jnp.dtype(compute_dtype).itemsize
    out_bytes = out_ch * 4
    ts_cap = max(128, (8 * 1024 * 1024) // (2 * (in_bytes + out_bytes)))
    if S <= ts_cap:
        TS = S                        # full extent: any size is legal
    else:
        TS = (ts_cap // 128) * 128    # lane-aligned tile; tail block masked by Pallas
    grid = (B, pl.cdiv(S, TS))

    out = pl.pallas_call(
        _hwd_kernel,
        out_shape=jax.ShapeDtypeStruct((B, out_ch, S), jnp.float32),
        grid=grid,
        in_specs=[
            pl.BlockSpec((1, 4 * C, TS), lambda b, s: (b, 0, s)),
            pl.BlockSpec((out_ch, 4 * C), lambda b, s: (0, 0)),
            pl.BlockSpec((out_ch, 1), lambda b, s: (0, 0)),
        ],
        out_specs=pl.BlockSpec((1, out_ch, TS), lambda b, s: (b, 0, s)),
        compiler_params=pltpu.CompilerParams(
            dimension_semantics=("parallel", "parallel"),
            vmem_limit_bytes=32 * 1024 * 1024,
        ),
    )(xt, wfold, shift)

    # Output is already channel-major: free reshape to NCHW.
    return out.reshape(B, out_ch, Ho, Wo)


def _reference(x, weight, gamma, beta, mean, var, eps=1e-5):
    # Pure-JAX reference of the original module math (un-folded) for checking.
    a = x[:, :, 0::2, 0::2]
    b = x[:, :, 0::2, 1::2]
    c = x[:, :, 1::2, 0::2]
    d = x[:, :, 1::2, 1::2]
    ll = (a + b + c + d) * 0.5
    h0 = (a + b - c - d) * 0.5
    h1 = (a - b + c - d) * 0.5
    h2 = (a - b - c + d) * 0.5
    cat = jnp.concatenate([ll, h0, h1, h2], axis=1)              # (B, 4C, Ho, Wo)
    y = jnp.einsum('oc,bchw->bohw', weight, cat)
    scale = gamma / jnp.sqrt(var + eps)
    shift = beta - mean * scale
    y = y * scale[None, :, None, None] + shift[None, :, None, None]
    return y * jax.nn.sigmoid(y)


if __name__ == "__main__":
    key = jax.random.PRNGKey(0)
    B, C, H, W = 2, 4, 16, 16
    out_ch = 8

    kx, kw, kg, kb, km, kv = jax.random.split(key, 6)
    x = jax.random.normal(kx, (B, C, H, W), dtype=jnp.float32)
    weight = jax.random.normal(kw, (out_ch, 4 * C), dtype=jnp.float32) * 0.1
    gamma = 1.0 + 0.1 * jax.random.normal(kg, (out_ch,), dtype=jnp.float32)
    beta = 0.1 * jax.random.normal(kb, (out_ch,), dtype=jnp.float32)
    running_mean = 0.1 * jax.random.normal(km, (out_ch,), dtype=jnp.float32)
    running_var = 1.0 + 0.1 * jax.random.uniform(kv, (out_ch,), dtype=jnp.float32)

    ref = _reference(x, weight, gamma, beta, running_mean, running_var)

    # f32 path (bitwise-faithful to the PyTorch module semantics)
    out = hwd_forward(x, weight, gamma, beta, running_mean, running_var)
    out = jax.block_until_ready(out)
    assert out.shape == (B, out_ch, H // 2, W // 2)
    np.testing.assert_allclose(np.asarray(out), np.asarray(ref),
                               rtol=1e-5, atol=1e-5)

    # bf16 input/weight path (bandwidth optimization for v6e/v7x); loose check.
    out_bf16 = hwd_forward(x, weight, gamma, beta, running_mean, running_var,
                           compute_dtype=jnp.bfloat16)
    out_bf16 = jax.block_until_ready(out_bf16)
    np.testing.assert_allclose(np.asarray(out_bf16), np.asarray(ref),
                               rtol=0.1, atol=0.1)

    print("KERNEL_OK")
</pallas_src>

<mosaic_0001>
module attributes {stable_mosaic.version = 11 : i64} {
  func.func @_hwd_kernel(%arg0: i32, %arg1: i32, %arg2: memref<1x16x64xf32, #tpu.memory_space<vmem>>, %arg3: memref<8x16xf32, #tpu.memory_space<vmem>>, %arg4: memref<8x1xf32, #tpu.memory_space<vmem>>, %arg5: memref<1x8x64xf32, #tpu.memory_space<vmem>>) attributes {dimension_semantics = [#tpu.dimension_semantics<parallel>, #tpu.dimension_semantics<parallel>], iteration_bounds = array<i64: 2, 1>, scalar_prefetch = 0 : i64, scratch_operands = 0 : i64, tpu.core_type = #tpu.core_type<tc>, window_params = [{transform_indices = @transform_0, window_bounds = array<i64: 1, 16, 64>}, {pipeline_mode = #tpu.pipeline_mode<synchronous>, transform_indices = @transform_1, window_bounds = array<i64: 8, 16>}, {pipeline_mode = #tpu.pipeline_mode<synchronous>, transform_indices = @transform_2, window_bounds = array<i64: 8, 1>}, {transform_indices = @transform_3, window_bounds = array<i64: 1, 8, 64>}]} {
    %c0 = arith.constant 0 : index
    %c0_0 = arith.constant 0 : index
    %0 = vector.load %arg3[%c0, %c0_0] : memref<8x16xf32, #tpu.memory_space<vmem>>, vector<8x16xf32>
    %c0_1 = arith.constant 0 : index
    %c0_2 = arith.constant 0 : index
    %c0_3 = arith.constant 0 : index
    %1 = vector.load %arg2[%c0_1, %c0_2, %c0_3] : memref<1x16x64xf32, #tpu.memory_space<vmem>>, vector<1x16x64xf32>
    %2 = vector.shape_cast %1 : vector<1x16x64xf32> to vector<16x64xf32>
    %cst = arith.constant dense<0.000000e+00> : vector<8x64xf32>
    %3 = tpu.matmul %0, %2, %cst {dimension_numbers = #tpu.dot_dimension_numbers<[1], [0], [0], [1], [0, 0, 1, 1], [], []>} : vector<8x16xf32>, vector<16x64xf32>, vector<8x64xf32> -> vector<8x64xf32>
    %c0_4 = arith.constant 0 : index
    %c0_5 = arith.constant 0 : index
    %4 = vector.load %arg4[%c0_4, %c0_5] : memref<8x1xf32, #tpu.memory_space<vmem>>, vector<8x1xf32>
    %5 = vector.broadcast %4 : vector<8x1xf32> to vector<8x64xf32>
    %6 = arith.addf %3, %5 : vector<8x64xf32>
    %7 = arith.negf %6 : vector<8x64xf32>
    %8 = math.exp %7 : vector<8x64xf32>
    %cst_6 = arith.constant 1.000000e+00 : f32
    %9 = vector.broadcast %cst_6 : f32 to vector<8x64xf32>
    %10 = arith.addf %9, %8 : vector<8x64xf32>
    %11 = arith.divf %9, %10 : vector<8x64xf32>
    %12 = arith.mulf %6, %11 : vector<8x64xf32>
    %c0_7 = arith.constant 0 : index
    %c0_8 = arith.constant 0 : index
    %c0_9 = arith.constant 0 : index
    %13 = vector.load %arg5[%c0_7, %c0_8, %c0_9] : memref<1x8x64xf32, #tpu.memory_space<vmem>>, vector<1x8x64xf32>
    %14 = vector.shape_cast %13 : vector<1x8x64xf32> to vector<8x64xf32>
    %15 = vector.shape_cast %12 : vector<8x64xf32> to vector<1x8x64xf32>
    tpu.vector_store %arg5[%c0_7, %c0_8, %c0_9], %15 {strides = array<i32>} : memref<1x8x64xf32, #tpu.memory_space<vmem>>, vector<1x8x64xf32>,
    return
  }
  func.func @transform_0(%arg0: i32, %arg1: i32) -> (i32, i32, i32) {
    %c0_i32 = arith.constant 0 : i32
    %c0_i32_0 = arith.constant 0 : i32
    return %arg0, %c0_i32, %arg1 : i32, i32, i32
  }
  func.func @transform_1(%arg0: i32, %arg1: i32) -> (i32, i32) {
    %c0_i32 = arith.constant 0 : i32
    %c0_i32_0 = arith.constant 0 : i32
    %c0_i32_1 = arith.constant 0 : i32
    return %c0_i32, %c0_i32_0 : i32, i32
  }
  func.func @transform_2(%arg0: i32, %arg1: i32) -> (i32, i32) {
    %c0_i32 = arith.constant 0 : i32
    %c0_i32_0 = arith.constant 0 : i32
    %c0_i32_1 = arith.constant 0 : i32
    return %c0_i32, %c0_i32_0 : i32, i32
  }
  func.func @transform_3(%arg0: i32, %arg1: i32) -> (i32, i32, i32) {
    %c0_i32 = arith.constant 0 : i32
    %c0_i32_0 = arith.constant 0 : i32
    return %arg0, %c0_i32, %arg1 : i32, i32, i32
  }
}

</mosaic_0001>

<bundles_post_ra>
// kernel: hwd_forward.1
= control target key start
LH: loop header
LB: loop body
LE: loop exit
PB: predicated region body
PF: predicated region fallthrough
CT: control target
= control target key end

     0   :  { %s420_s12 = smov 0   ;;  %s422_s13 = smov 0   ;;  %s463_s0 = inlined_call_operand.vmem [shape: f32[2,16,64], index: 0, kind: input, shape index: {}]   ;;  %s464_s1 = inlined_call_operand.vmem [shape: f32[8,16], index: 1, kind: input, shape index: {}]   ;;  %s465_s2 = inlined_call_operand.vmem [shape: f32[8,1], index: 2, kind: input, shape index: {}]   ;;  %s466_s3 = inlined_call_operand.vmem [shape: f32[2,8,64], index: 3, kind: output, shape index: {}]  }
   0x1   :  { %s424_s14 = smov 0  }
   0x2 LB: > { %s25_s15 = sadd.s32 1, %s393_s13  ;;  %p336_p0 = scmp.ge.s32.totalorder %s397_s14, 1  ;;  %s397_s14 = sphi %s424_s14, %s13_s14   ;;  %s393_s13 = sphi %s422_s13, %s468_s13   ;;  %s389_s12 = sphi %s420_s12, %s467_s12  }
   0x3   : > { %p27_p1 = scmp.ge.s32.totalorder %s25_s15, 2  ;;  %p156_p2 = scmp.lt.s32.totalorder %s397_s14, 3 }
   0x5   : > { %s470_s15 = smov (%p27_p1, %s25_s15), 0  ;;  %p157_p3 = pnand %p336_p0, %p156_p2 }
   0x6   : > { %p185_p4 = scmp.lt.s32.totalorder (!%p157_p3), %s389_s12, 1 }
   0x7   : > { %160 = sbr.rel (%p157_p3) target bundleno = 178 (0xb2), region = 32 }
   0xc   : > { %v203_v0 = vld [vmem:[%s465_s2] sm:$0xff]  ;;  %v399_v1 = vmov 0   ;;  %s472_s12 = smov (!%p185_p4, %s389_s12), 1  ;;  %vm209_vm0 = vcmask 130048   ;;  %vm253_vm5 = vcmask 523264  }
   0xd   : > { %370 = vset.pattern.permute.xlu0 %v399_v1  ;;  %s344_s18 = sshll.u32 %s472_s12, 4  ;;  %v200_v4 = vld [vmem:[%s464_s1] sm:$0xff]  ;;  %s339_s24 = sshll.u32 %s472_s12, 3 }
   0xe   : > { %206 = vperm.xlu0 %370, %v203_v0   ;;  %s192_s21 = scalar_lea.vmem %s463_s0, %s344_s18  ;;  %s199_s27 = scalar_lea.vmem %s466_s3, %s339_s24 }
   0xf   : > { %v202_v2 = vld [vmem:[%s192_s21 + $0x8] sm:$0xff]  ;;  %v201_v3 = vld [vmem:[%s192_s21] sm:$0xff] }
  0x10   : > { %227 = vmatpush.msra.mxu0 %v202_v2 }
  0x12   : > { %228 = vmatpush.msra.mxu0 %v201_v3 }
  0x13   : > { %340 = vmatmul.msk.f32.vlgmr.msra.gmra.mxu0 %vm209_vm0, %v200_v4 }
  0x80   : > { %v207_v5 = vpop.permute.xlu0 %206 }
  0x90   : > { %v230_v6 = vpop.f32.mrf.mxu0 }
  0x91   : > { %v231_v7 = vadd.f32 %v230_v6, %v207_v5 }
  0x93   : > { %v341_v8 = vmul.f32 -1.442695, %v231_v7 }
  0x95   : > { %371 = vpow2.f32 %v341_v8 }
  0x9b   : > { %v372_v9 = vpop.eup %371 }
  0x9c   : > { %v236_v10 = vadd.f32 1.0, %v372_v9 }
  0x9e   : > { %373 = vrcp.f32 %v236_v10  ;;  %v248_v14 = vand.u32 2147483648, %v236_v10  ;;  %v246_v16 = vand.u32 2147483647, %v236_v10  ;;  %vm242_vm2 = vweird.f32 %v236_v10 }
  0xa0   : > { %v249_v18 = vor.u32 1.1754944e-38, %v248_v14  ;;  %vm247_vm4 = vcmp.eq.f32.partialorder %v246_v16, 8.507059e+37 }
  0xa4   : > { %v374_v11 = vpop.eup %373 }
  0xa5   : > { %v238_v12 = vmul.f32 %v374_v11, %v236_v10  ;;  %vm243_vm1 = vweird.f32 %v374_v11 }
  0xa6   : > { %vm244_vm3 = vmor %vm242_vm2, %vm243_vm1 }
  0xa7   : > { %v239_v13 = vsub.f32 1.0, %v238_v12 }
  0xa9   : > { %v240_v15 = vmul.f32 %v374_v11, %v239_v13 }
  0xab   : > { %v241_v17 = vadd.f32 %v374_v11, %v240_v15 }
  0xad   : > { %v245_v19 = vsel %vm244_vm3, %v374_v11, %v241_v17 }
  0xae   : > { %v250_v20 = vsel %vm247_vm4, %v249_v18, %v245_v19 }
  0xaf   : > { %v252_v21 = vmul.f32 %v250_v20, %v231_v7 }
  0xb1   : > { %254 = vst.msk [vmem:[%s199_s27] sm:$0xff] %vm253_vm5, %v252_v21 }
  0xb2 PF: > { %s13_s14 = sadd.s32 1, %s397_s14   ;;  %s467_s12 = smov %s393_s13 }
  0xb3   : > { %p10_p5 = scmp.ge.s32.totalorder %s13_s14, 4   ;;  %s468_s13 = smov %s470_s15 }
  0xb5   :  { %12 = sbr.rel (!%p10_p5) target bundleno = 2 (0x2), region = 62 }

</bundles_post_ra>
